<compile_context>
chip_gen: v7x
topology: tpu7x:2x2x1
jax: 0.10.0
libtpu: 0.0.40
codegen_flags: <defaults>
</compile_context>

<pallas_src>
from functools import partial

import numpy as np
import jax
import jax.numpy as jnp
from jax.experimental import pallas as pl
from jax.experimental.pallas import tpu as pltpu


def make_kernel(k):
    """NumPy equivalent of the PyTorch make_kernel (sum-normalized outer product)."""
    k = np.asarray(k, dtype=np.float32)
    if k.ndim == 1:
        k = k[None, :] * k[:, None]
    k = k / k.sum()
    return k


_BLOCK_BUDGET = 4 * 2**20        # target per-grid-step working set (bytes)


def _round_up(a, b):
    return -(-a // b) * b


def _vmem_capacity_bytes():
    try:
        return int(pltpu.get_tpu_info().vmem_capacity_bytes)
    except Exception:
        return 64 * 2**20        # v7x per-core physical VMEM (most restrictive gen)


def _vmem_limit(need_bytes):
    cap = (_vmem_capacity_bytes() * 3) // 4
    return int(min(cap, max(32 * 2**20, need_bytes)))


# ----------------------------------------------------------------------------
# Kernel bodies.  Both receive a main row-band block, an 8-row halo block (the
# next rows of the same array), write them into a contiguous band scratch, and
# run either the separable (vertical then horizontal 1-D) tap loops or the
# generic 2-D tap loop.  All tap weights are compile-time python floats, so the
# taps are pure VPU scalar-FMAs on shifted whole-block loads.
# ----------------------------------------------------------------------------
def _blur_kernel_clanes(x_ref, halo_ref, o_ref, band_ref, *,
                        th, Wo, taps_v, taps_h, taps_2d):
    # blocks: x (1, th, Wp, ct), halo (1, HALO, Wp, ct), o (1, th, Wo, ct)
    # band scratch (th+HALO, Wp, ct); channels on the 128-lane axis.
    band_ref[:th] = x_ref[0]
    band_ref[th:] = halo_ref[0]
    if taps_2d is None:
        tmp = None                                   # vertical (H) pass
        for dh, w in taps_v:
            t = band_ref[dh:dh + th] * w
            tmp = t if tmp is None else tmp + t
        acc = None                                   # horizontal (W) pass
        for dw, w in taps_h:
            # TODO(synk): a pltpu.roll on the sublane (W) axis would move these
            # misaligned shifts onto the XLU slot; static slices kept for safety.
            t = tmp[:, dw:dw + Wo, :] * w
            acc = t if acc is None else acc + t
    else:
        acc = None
        for dh, dw, w in taps_2d:
            t = band_ref[dh:dh + th, dw:dw + Wo, :] * w
            acc = t if acc is None else acc + t
    o_ref[0] = acc.astype(o_ref.dtype)


def _blur_kernel_wlanes(x_ref, halo_ref, o_ref, band_ref, *,
                        th, Wo, taps_v, taps_h, taps_2d):
    # blocks: x (bct, th, Wp), halo (bct, HALO, Wp), o (bct, th, Wo)
    # band scratch (bct, th+HALO, Wp); W on the 128-lane axis, H on sublanes.
    band_ref[:, :th, :] = x_ref[...]
    band_ref[:, th:, :] = halo_ref[...]
    if taps_2d is None:
        tmp = None
        for dh, w in taps_v:
            t = band_ref[:, dh:dh + th, :] * w
            tmp = t if tmp is None else tmp + t
        acc = None
        for dw, w in taps_h:
            t = tmp[:, :, dw:dw + Wo] * w
            acc = t if acc is None else acc + t
    else:
        acc = None
        for dh, dw, w in taps_2d:
            t = band_ref[:, dh:dh + th, dw:dw + Wo] * w
            acc = t if acc is None else acc + t
    o_ref[...] = acc.astype(o_ref.dtype)


# ----------------------------------------------------------------------------
# Wrapper: upfirdn2d(x, kernel, up=1, down=1, pad=pad), NCHW in / NCHW out.
# ----------------------------------------------------------------------------
def blur(x_nchw, kernel_2d, pad, *, block_rows=None):
    kernel_2d = np.asarray(kernel_2d, dtype=np.float32)
    Kh, Kw = kernel_2d.shape
    p0, p1 = int(pad[0]), int(pad[1])
    N, C, H, W = map(int, x_nchw.shape)
    itemsize = jnp.dtype(x_nchw.dtype).itemsize

    Hp0 = H + p0 + p1
    Wp0 = W + p0 + p1
    Ho, Wo = Hp0 - Kh + 1, Wp0 - Kw + 1
    assert Ho > 0 and Wo > 0, "blur kernel larger than padded input"

    # upfirdn2d correlates with the flipped kernel; bake static tap weights and
    # factor the (always rank-1 for make_kernel) kernel into 1-D passes.
    kf = np.ascontiguousarray(kernel_2d[::-1, ::-1])
    u, s, vt = np.linalg.svd(kf)
    kv, kw_ = u[:, 0] * s[0], vt[0]
    separable = np.max(np.abs(np.outer(kv, kw_) - kf)) <= 1e-6 * max(np.max(np.abs(kf)), 1e-30)
    if separable:
        taps_v = tuple((dh, float(kv[dh])) for dh in range(Kh))
        taps_h = tuple((dw, float(kw_[dw])) for dw in range(Kw))
        taps_2d = None
    else:
        taps_v = taps_h = ()
        taps_2d = tuple((dh, dw, float(kf[dh, dw]))
                        for dh in range(Kh) for dw in range(Kw) if kf[dh, dw] != 0.0)
        if not taps_2d:
            taps_2d = ((0, 0, 0.0),)

    # Halo rows fetched below each row band; multiple of 8 so the halo is an
    # ordinary blocked window of the same (already padded) input array.
    HALO = max(8, _round_up(Kh - 1, 8))
    Hcap = _round_up(Ho, HALO)

    def pick_rows(per_row_bytes):
        if block_rows is not None:
            th = _round_up(max(int(block_rows), 1), HALO)
        else:
            th = (max(_BLOCK_BUDGET // max(per_row_bytes, 1), HALO) // HALO) * HALO
        return int(min(Hcap, max(HALO, th)))

    # Layout: channels on lanes only when the channel count is the wider axis
    # (low-res / high-C layers); otherwise W on lanes (lane-dense for high-res,
    # low-C and ToRGB layers, and needs no transposes at all).
    use_c_lanes = (C >= 128) and (C >= Wo)

    crop0, crop1 = max(-p0, 0), max(-p1, 0)
    pad0, pad1 = max(p0, 0), max(p1, 0)

    if use_c_lanes:
        # ---- channels on the 128-lane axis (NHWC) ----
        per_row = lambda c: c * ((3 * Wp0 + 2 * Wo) * itemsize + (Wp0 + Wo) * 4)
        ct = C
        while ct % 256 == 0 and per_row(ct) * HALO > 2 * _BLOCK_BUDGET:
            ct //= 2                                 # split channels only when forced
        th = pick_rows(per_row(ct))
        nh = -(-Ho // th)
        Hp = nh * th + HALO
        hb = th // HALO

        x = jnp.transpose(x_nchw, (0, 2, 3, 1))
        x = jnp.pad(x, ((0, 0), (pad0, pad1), (pad0, pad1), (0, 0)))
        x = x[:, crop0: x.shape[1] - crop1, crop0: x.shape[2] - crop1, :]
        x = jnp.pad(x, ((0, 0), (0, Hp - Hp0), (0, 0), (0, 0)))   # row-band alignment
        Wp = Wp0

        grid = (nh, N, C // ct)
        kernel_fn = partial(_blur_kernel_clanes, th=th, Wo=Wo,
                            taps_v=taps_v, taps_h=taps_h, taps_2d=taps_2d)
        in_specs = [
            pl.BlockSpec((1, th, Wp, ct), lambda h, n, c: (n, h, 0, c)),
            pl.BlockSpec((1, HALO, Wp, ct), lambda h, n, c: (n, (h + 1) * hb, 0, c)),
        ]
        out_specs = pl.BlockSpec((1, th, Wo, ct), lambda h, n, c: (n, h, 0, c))
        out_shape = jax.ShapeDtypeStruct((N, nh * th, Wo, C), x.dtype)
        scratch = [pltpu.VMEM((th + HALO, Wp, ct), x.dtype)]

        io_bytes = ct * itemsize * ((th + HALO) * Wp + th * Wo)
        work_bytes = ct * itemsize * ((th + HALO) * Wp + th * (Wp + Wo))
        vmem_need = 2 * io_bytes + work_bytes + (2 << 20)

        out = pl.pallas_call(
            kernel_fn,
            out_shape=out_shape,
            grid_spec=pltpu.PrefetchScalarGridSpec(
                num_scalar_prefetch=0, grid=grid,
                in_specs=in_specs, out_specs=out_specs, scratch_shapes=scratch),
            compiler_params=pltpu.CompilerParams(
                dimension_semantics=("parallel",) * len(grid),
                vmem_limit_bytes=_vmem_limit(vmem_need)),
        )(x, x)
        return jnp.transpose(out[:, :Ho], (0, 3, 1, 2))

    else:
        # ---- W on the 128-lane axis, (N*C) flattened: no transposes needed ----
        NC = N * C
        per_row = (3 * Wp0 + 2 * Wo) * itemsize + (Wp0 + Wo) * 4
        th = pick_rows(per_row)
        nh = -(-Ho // th)
        Hp = nh * th + HALO
        hb = th // HALO

        bct = max(1, min(NC, _BLOCK_BUDGET // max(th * per_row, 1)))
        while NC % bct:
            bct -= 1

        x = x_nchw.reshape(NC, H, W)
        x = jnp.pad(x, ((0, 0), (pad0, pad1), (pad0, pad1)))
        x = x[:, crop0: x.shape[1] - crop1, crop0: x.shape[2] - crop1]
        x = jnp.pad(x, ((0, 0), (0, Hp - Hp0), (0, 0)))          # row-band alignment
        Wp = Wp0

        grid = (nh, NC // bct)
        kernel_fn = partial(_blur_kernel_wlanes, th=th, Wo=Wo,
                            taps_v=taps_v, taps_h=taps_h, taps_2d=taps_2d)
        in_specs = [
            pl.BlockSpec((bct, th, Wp), lambda h, b: (b, h, 0)),
            pl.BlockSpec((bct, HALO, Wp), lambda h, b: (b, (h + 1) * hb, 0)),
        ]
        out_specs = pl.BlockSpec((bct, th, Wo), lambda h, b: (b, h, 0))
        out_shape = jax.ShapeDtypeStruct((NC, nh * th, Wo), x.dtype)
        scratch = [pltpu.VMEM((bct, th + HALO, Wp), x.dtype)]

        io_bytes = bct * itemsize * ((th + HALO) * Wp + th * Wo)
        work_bytes = bct * itemsize * ((th + HALO) * Wp + th * (Wp + Wo))
        vmem_need = 2 * io_bytes + work_bytes + (2 << 20)

        out = pl.pallas_call(
            kernel_fn,
            out_shape=out_shape,
            grid_spec=pltpu.PrefetchScalarGridSpec(
                num_scalar_prefetch=0, grid=grid,
                in_specs=in_specs, out_specs=out_specs, scratch_shapes=scratch),
            compiler_params=pltpu.CompilerParams(
                dimension_semantics=("parallel",) * len(grid),
                vmem_limit_bytes=_vmem_limit(vmem_need)),
        )(x, x)
        return out[:, :Ho].reshape(N, C, Ho, Wo)


def _blur_reference(x_nchw, kernel_2d, pad):
    """Pure-JAX upfirdn2d (up=down=1) reference, matching the PyTorch native impl."""
    kernel_2d = jnp.asarray(np.asarray(kernel_2d, dtype=np.float32))
    Kh, Kw = kernel_2d.shape
    p0, p1 = int(pad[0]), int(pad[1])
    N, C, H, W = x_nchw.shape
    xp = jnp.pad(x_nchw, ((0, 0), (0, 0),
                          (max(p0, 0), max(p1, 0)),
                          (max(p0, 0), max(p1, 0))))
    xp = xp[:, :, max(-p0, 0): xp.shape[2] - max(-p1, 0),
                  max(-p0, 0): xp.shape[3] - max(-p1, 0)]
    Hp, Wp = xp.shape[2], xp.shape[3]
    w = jnp.flip(kernel_2d, (0, 1))[None, None]                  # (1,1,Kh,Kw)
    out = jax.lax.conv_general_dilated(
        xp.reshape(N * C, 1, Hp, Wp), w, (1, 1), "VALID",
        dimension_numbers=("NCHW", "OIHW", "NCHW"))
    return out.reshape(N, C, Hp - Kh + 1, Wp - Kw + 1)


if __name__ == "__main__":
    key = jax.random.PRNGKey(0)

    # 1) Blur([1,3,3,1], pad=(2,1), upsample_factor=2) -- StyleGAN2 Upsample/ToRGB
    #    path -- small shape; W-on-lanes layout, separable taps, single row band.
    k_up = make_kernel([1, 3, 3, 1]) * (2 ** 2)
    # 2) Same blur taps, channels-on-lanes layout (C=128) with forced 16-row
    #    bands so the halo across row tiles is exercised.
    k_plain = make_kernel([1, 3, 3, 1])
    # 3) A non-separable 2-D kernel -> generic 2-D tap fallback, multiple row bands.
    k_2d = make_kernel(np.array([[1., 2., 1.], [2., 8., 2.], [1., 2., 4.]], np.float32))

    cases = [
        ((2, 4, 16, 16), k_up, (2, 1), None),
        ((1, 128, 32, 32), k_plain, (2, 1), 16),
        ((2, 8, 40, 24), k_2d, (1, 1), 8),
    ]

    for shape, k2d, pad, rows in cases:
        key, sub = jax.random.split(key)
        x = jax.random.normal(sub, shape, dtype=jnp.float32)
        out = jax.block_until_ready(blur(x, k2d, pad, block_rows=rows))
        ref = _blur_reference(x, k2d, pad)
        assert out.shape == ref.shape, (out.shape, ref.shape)
        err = float(jnp.max(jnp.abs(out - ref)))
        assert err < 2e-4, (shape, err)

    print("KERNEL_OK")
</pallas_src>

<mosaic_0001>
module attributes {stable_mosaic.version = 11 : i64} {
  func.func @_blur_kernel_wlanes(%arg0: i32, %arg1: i32, %arg2: memref<8x16x19xf32, #tpu.memory_space<vmem>>, %arg3: memref<8x8x19xf32, #tpu.memory_space<vmem>>, %arg4: memref<8x16x16xf32, #tpu.memory_space<vmem>>, %arg5: memref<8x24x19xf32, #tpu.memory_space<vmem>>) attributes {dimension_semantics = [#tpu.dimension_semantics<parallel>, #tpu.dimension_semantics<parallel>], iteration_bounds = array<i64: 1, 1>, scalar_prefetch = 0 : i64, scratch_operands = 1 : i64, tpu.core_type = #tpu.core_type<tc>, window_params = [{transform_indices = @transform_0, window_bounds = array<i64: 8, 16, 19>}, {transform_indices = @transform_1, window_bounds = array<i64: 8, 8, 19>}, {transform_indices = @transform_2, window_bounds = array<i64: 8, 16, 16>}]} {
    %c0 = arith.constant 0 : index
    %c0_0 = arith.constant 0 : index
    %c0_1 = arith.constant 0 : index
    %0 = vector.load %arg2[%c0, %c0_0, %c0_1] : memref<8x16x19xf32, #tpu.memory_space<vmem>>, vector<8x16x19xf32>
    %c0_2 = arith.constant 0 : index
    %c0_3 = arith.constant 0 : index
    %c0_4 = arith.constant 0 : index
    %1 = vector.load %arg5[%c0_2, %c0_3, %c0_4] : memref<8x24x19xf32, #tpu.memory_space<vmem>>, vector<8x16x19xf32>
    tpu.vector_store %arg5[%c0_2, %c0_3, %c0_4], %0 {strides = array<i32>} : memref<8x24x19xf32, #tpu.memory_space<vmem>>, vector<8x16x19xf32>,
    %c0_5 = arith.constant 0 : index
    %c0_6 = arith.constant 0 : index
    %c0_7 = arith.constant 0 : index
    %2 = vector.load %arg3[%c0_5, %c0_6, %c0_7] : memref<8x8x19xf32, #tpu.memory_space<vmem>>, vector<8x8x19xf32>
    %c0_8 = arith.constant 0 : index
    %c16 = arith.constant 16 : index
    %c0_9 = arith.constant 0 : index
    %3 = vector.load %arg5[%c0_8, %c16, %c0_9] : memref<8x24x19xf32, #tpu.memory_space<vmem>>, vector<8x8x19xf32>
    tpu.vector_store %arg5[%c0_8, %c16, %c0_9], %2 {strides = array<i32>} : memref<8x24x19xf32, #tpu.memory_space<vmem>>, vector<8x8x19xf32>,
    %c0_10 = arith.constant 0 : index
    %c0_11 = arith.constant 0 : index
    %c0_12 = arith.constant 0 : index
    %4 = vector.load %arg5[%c0_10, %c0_11, %c0_12] : memref<8x24x19xf32, #tpu.memory_space<vmem>>, vector<8x16x19xf32>
    %cst = arith.constant -0.279508501 : f32
    %5 = vector.broadcast %cst : f32 to vector<8x16x19xf32>
    %6 = arith.mulf %4, %5 : vector<8x16x19xf32>
    %c0_13 = arith.constant 0 : index
    %c1 = arith.constant 1 : index
    %c0_14 = arith.constant 0 : index
    %7 = vector.load %arg5[%c0_13, %c1, %c0_14] : memref<8x24x19xf32, #tpu.memory_space<vmem>>, vector<8x16x19xf32>
    %cst_15 = arith.constant -0.838525534 : f32
    %8 = vector.broadcast %cst_15 : f32 to vector<8x16x19xf32>
    %9 = arith.mulf %7, %8 : vector<8x16x19xf32>
    %10 = arith.addf %6, %9 : vector<8x16x19xf32>
    %c0_16 = arith.constant 0 : index
    %c2 = arith.constant 2 : index
    %c0_17 = arith.constant 0 : index
    %11 = vector.load %arg5[%c0_16, %c2, %c0_17] : memref<8x24x19xf32, #tpu.memory_space<vmem>>, vector<8x16x19xf32>
    %cst_18 = arith.constant -0.838525534 : f32
    %12 = vector.broadcast %cst_18 : f32 to vector<8x16x19xf32>
    %13 = arith.mulf %11, %12 : vector<8x16x19xf32>
    %14 = arith.addf %10, %13 : vector<8x16x19xf32>
    %c0_19 = arith.constant 0 : index
    %c3 = arith.constant 3 : index
    %c0_20 = arith.constant 0 : index
    %15 = vector.load %arg5[%c0_19, %c3, %c0_20] : memref<8x24x19xf32, #tpu.memory_space<vmem>>, vector<8x16x19xf32>
    %cst_21 = arith.constant -0.279508501 : f32
    %16 = vector.broadcast %cst_21 : f32 to vector<8x16x19xf32>
    %17 = arith.mulf %15, %16 : vector<8x16x19xf32>
    %18 = arith.addf %14, %17 : vector<8x16x19xf32>
    %19 = vector.extract_strided_slice %18 {offsets = [0, 0, 0], sizes = [8, 16, 16], strides = [1, 1, 1]} : vector<8x16x19xf32> to vector<8x16x16xf32>
    %cst_22 = arith.constant -0.223606795 : f32
    %20 = vector.broadcast %cst_22 : f32 to vector<8x16x16xf32>
    %21 = arith.mulf %19, %20 : vector<8x16x16xf32>
    %22 = vector.extract_strided_slice %18 {offsets = [0, 0, 1], sizes = [8, 16, 16], strides = [1, 1, 1]} : vector<8x16x19xf32> to vector<8x16x16xf32>
    %cst_23 = arith.constant -0.670820415 : f32
    %23 = vector.broadcast %cst_23 : f32 to vector<8x16x16xf32>
    %24 = arith.mulf %22, %23 : vector<8x16x16xf32>
    %25 = arith.addf %21, %24 : vector<8x16x16xf32>
    %26 = vector.extract_strided_slice %18 {offsets = [0, 0, 2], sizes = [8, 16, 16], strides = [1, 1, 1]} : vector<8x16x19xf32> to vector<8x16x16xf32>
    %cst_24 = arith.constant -0.670820415 : f32
    %27 = vector.broadcast %cst_24 : f32 to vector<8x16x16xf32>
    %28 = arith.mulf %26, %27 : vector<8x16x16xf32>
    %29 = arith.addf %25, %28 : vector<8x16x16xf32>
    %30 = vector.extract_strided_slice %18 {offsets = [0, 0, 3], sizes = [8, 16, 16], strides = [1, 1, 1]} : vector<8x16x19xf32> to vector<8x16x16xf32>
    %cst_25 = arith.constant -0.223606795 : f32
    %31 = vector.broadcast %cst_25 : f32 to vector<8x16x16xf32>
    %32 = arith.mulf %30, %31 : vector<8x16x16xf32>
    %33 = arith.addf %29, %32 : vector<8x16x16xf32>
    %c0_26 = arith.constant 0 : index
    %c0_27 = arith.constant 0 : index
    %c0_28 = arith.constant 0 : index
    %34 = vector.load %arg4[%c0_26, %c0_27, %c0_28] : memref<8x16x16xf32, #tpu.memory_space<vmem>>, vector<8x16x16xf32>
    tpu.vector_store %arg4[%c0_26, %c0_27, %c0_28], %33 {strides = array<i32>} : memref<8x16x16xf32, #tpu.memory_space<vmem>>, vector<8x16x16xf32>,
    return
  }
  func.func @transform_0(%arg0: i32, %arg1: i32) -> (i32, i32, i32) {
    %c0_i32 = arith.constant 0 : i32
    %c0_i32_0 = arith.constant 0 : i32
    return %arg1, %arg0, %c0_i32 : i32, i32, i32
  }
  func.func @transform_1(%arg0: i32, %arg1: i32) -> (i32, i32, i32) {
    %c1_i32 = arith.constant 1 : i32
    %0 = arith.addi %arg0, %c1_i32 : i32
    %c2_i32 = arith.constant 2 : i32
    %1 = arith.muli %0, %c2_i32 : i32
    %c0_i32 = arith.constant 0 : i32
    %c0_i32_0 = arith.constant 0 : i32
    return %arg1, %1, %c0_i32 : i32, i32, i32
  }
  func.func @transform_2(%arg0: i32, %arg1: i32) -> (i32, i32, i32) {
    %c0_i32 = arith.constant 0 : i32
    %c0_i32_0 = arith.constant 0 : i32
    return %arg1, %arg0, %c0_i32 : i32, i32, i32
  }
}

</mosaic_0001>

<bundles_post_ra>
// kernel: tpu_custom_call.1
= control target key start
LH: loop header
LB: loop body
LE: loop exit
PB: predicated region body
PF: predicated region fallthrough
CT: control target
= control target key end

     0   :  { %vm190_vm0 = vcmask 154624   ;;  %s1078_s0 = inlined_call_operand.vmem [shape: f32[8,24,19], index: 0, kind: input, shape index: {}]   ;;  %s1079_s1 = inlined_call_operand.vmem [shape: f32[8,24,19], index: 1, kind: input, shape index: {}]   ;;  %s1080_s2 = inlined_call_operand.hbm [shape: f32[8,16,16], index: 2, kind: output, shape index: {}]  }
   0x1   :  { %v71_v0 = vld [vmem:[%s1078_s0 + $0x18] sm:$0xff]  ;;  %v73_v1 = vld [vmem:[%s1078_s0 + $0x20] sm:$0xff]  ;;  %v69_v3 = vld [vmem:[%s1078_s0 + $0x8] sm:$0xff] }
   0x2   :  { %v67_v2 = vld [vmem:[%s1078_s0] sm:$0xff]  ;;  %193 = vst.msk [vmem:[#allocation2 + $0x18] sm:$0xff] %vm190_vm0, %v71_v0  ;;  %194 = vst.msk [vmem:[#allocation2 + $0x20] sm:$0xff] %vm190_vm0, %v73_v1  ;;  %v698_v4 = vld [vmem:[%s1079_s1 + $0x28] sm:$0xff] }
   0x3   :  { %191 = vst.msk [vmem:[#allocation2] sm:$0xff] %vm190_vm0, %v67_v2  ;;  %v697_v5 = vld [vmem:[%s1079_s1 + $0x10] sm:$0xff]  ;;  %192 = vst.msk [vmem:[#allocation2 + $0x8] sm:$0xff] %vm190_vm0, %v69_v3  ;;  %v77_v6 = vld [vmem:[%s1078_s0 + $0x38] sm:$0xff] }
   0x4   :  { %216 = vst.msk [vmem:[#allocation2 + $0x28] sm:$0xff] %vm190_vm0, %v698_v4  ;;  %215 = vst.msk [vmem:[#allocation2 + $0x10] sm:$0xff] %vm190_vm0, %v697_v5  ;;  %v699_v7 = vld [vmem:[%s1079_s1 + $0x40] sm:$0xff]  ;;  %v75_v8 = vld [vmem:[%s1078_s0 + $0x30] sm:$0xff] }
   0x5   :  { %196 = vst.msk [vmem:[#allocation2 + $0x38] sm:$0xff] %vm190_vm0, %v77_v6  ;;  %217 = vst.msk [vmem:[#allocation2 + $0x40] sm:$0xff] %vm190_vm0, %v699_v7  ;;  %v81_v9 = vld [vmem:[%s1078_s0 + $0x50] sm:$0xff]  ;;  %v700_v10 = vld [vmem:[%s1079_s1 + $0x58] sm:$0xff] }
   0x6   :  { %195 = vst.msk [vmem:[#allocation2 + $0x30] sm:$0xff] %vm190_vm0, %v75_v8  ;;  %v79_v11 = vld [vmem:[%s1078_s0 + $0x48] sm:$0xff]  ;;  %198 = vst.msk [vmem:[#allocation2 + $0x50] sm:$0xff] %vm190_vm0, %v81_v9  ;;  %v701_v13 = vld [vmem:[%s1079_s1 + $0x70] sm:$0xff] }
   0x7   :  { %218 = vst.msk [vmem:[#allocation2 + $0x58] sm:$0xff] %vm190_vm0, %v700_v10  ;;  %197 = vst.msk [vmem:[#allocation2 + $0x48] sm:$0xff] %vm190_vm0, %v79_v11  ;;  %v85_v12 = vld [vmem:[%s1078_s0 + $0x68] sm:$0xff]  ;;  %v83_v14 = vld [vmem:[%s1078_s0 + $0x60] sm:$0xff] }
   0x8   :  { %200 = vst.msk [vmem:[#allocation2 + $0x68] sm:$0xff] %vm190_vm0, %v85_v12  ;;  %219 = vst.msk [vmem:[#allocation2 + $0x70] sm:$0xff] %vm190_vm0, %v701_v13  ;;  %v89_v15 = vld [vmem:[%s1078_s0 + $0x80] sm:$0xff]  ;;  %v702_v16 = vld [vmem:[%s1079_s1 + $0x88] sm:$0xff] }
   0x9   :  { %199 = vst.msk [vmem:[#allocation2 + $0x60] sm:$0xff] %vm190_vm0, %v83_v14  ;;  %v87_v17 = vld [vmem:[%s1078_s0 + $0x78] sm:$0xff]  ;;  %202 = vst.msk [vmem:[#allocation2 + $0x80] sm:$0xff] %vm190_vm0, %v89_v15  ;;  %v703_v19 = vld [vmem:[%s1079_s1 + $0xa0] sm:$0xff] }
   0xa   :  { %220 = vst.msk [vmem:[#allocation2 + $0x88] sm:$0xff] %vm190_vm0, %v702_v16  ;;  %201 = vst.msk [vmem:[#allocation2 + $0x78] sm:$0xff] %vm190_vm0, %v87_v17  ;;  %v93_v18 = vld [vmem:[%s1078_s0 + $0x98] sm:$0xff]  ;;  %v91_v20 = vld [vmem:[%s1078_s0 + $0x90] sm:$0xff] }
   0xb   :  { %204 = vst.msk [vmem:[#allocation2 + $0x98] sm:$0xff] %vm190_vm0, %v93_v18  ;;  %221 = vst.msk [vmem:[#allocation2 + $0xa0] sm:$0xff] %vm190_vm0, %v703_v19  ;;  %v97_v21 = vld [vmem:[%s1078_s0 + $0xb0] sm:$0xff]  ;;  %v704_v22 = vld [vmem:[%s1079_s1 + $0xb8] sm:$0xff] }
   0xc   :  { %203 = vst.msk [vmem:[#allocation2 + $0x90] sm:$0xff] %vm190_vm0, %v91_v20  ;;  %v95_v23 = vld [vmem:[%s1078_s0 + $0xa8] sm:$0xff]  ;;  %v225_v24 = vld [vmem:[#allocation2 + $0x18] sm:$0xff]  ;;  %206 = vst.msk [vmem:[#allocation2 + $0xb0] sm:$0xff] %vm190_vm0, %v97_v21  ;;  %s735_s0 = smov 127  }
   0xd   :  { %v257_v25 = vld [vmem:[#allocation2 + $0x19] sm:$0xff]  ;;  %222 = vst.msk [vmem:[#allocation2 + $0xb8] sm:$0xff] %vm190_vm0, %v704_v22  ;;  %205 = vst.msk [vmem:[#allocation2 + $0xa8] sm:$0xff] %vm190_vm0, %v95_v23  ;;  %v241_v27 = vmul.f32 -0.2795085, %v225_v24  ;;  %v255_v32 = vld [vmem:[#allocation2 + $0x1] sm:$0xff] }
   0xe   :  { %v305_v26 = vld [vmem:[#allocation2 + $0x1a] sm:$0xff]  ;;  %v273_v28 = vmul.f32 -0.83852553, %v257_v25  ;;  %v271_v36 = vmul.f32 -0.83852553, %v255_v32  ;;  %v303_v37 = vld [vmem:[#allocation2 + $0x2] sm:$0xff] }
   0xf   :  { %v321_v29 = vmul.f32 -0.83852553, %v305_v26  ;;  %v353_v30 = vld [vmem:[#allocation2 + $0x1b] sm:$0xff]  ;;  %v351_v38 = vld [vmem:[#allocation2 + $0x3] sm:$0xff]  ;;  %v319_v42 = vmul.f32 -0.83852553, %v303_v37 }
  0x10   :  { %v223_v31 = vld [vmem:[#allocation2] sm:$0xff]  ;;  %v289_v33 = vadd.f32 %v273_v28, %v241_v27  ;;  %v369_v34 = vmul.f32 -0.2795085, %v353_v30  ;;  %v367_v43 = vmul.f32 -0.2795085, %v351_v38  ;;  %v224_v52 = vld [vmem:[#allocation2 + $0x8] sm:$0xff] }
  0x11   :  { %v239_v35 = vmul.f32 -0.2795085, %v223_v31  ;;  %v226_v39 = vld [vmem:[#allocation2 + $0x20] sm:$0xff]  ;;  %v256_v53 = vld [vmem:[#allocation2 + $0x9] sm:$0xff]  ;;  %v240_v56 = vmul.f32 -0.2795085, %v224_v52 }
  0x12   :  { %v337_v40 = vadd.f32 %v321_v29, %v289_v33  ;;  %v258_v44 = vld [vmem:[#allocation2 + $0x21] sm:$0xff]  ;;  %v242_v46 = vmul.f32 -0.2795085, %v226_v39  ;;  %v272_v57 = vmul.f32 -0.83852553, %v256_v53  ;;  %v304_v60 = vld [vmem:[#allocation2 + $0xa] sm:$0xff] }
  0x13   :  { %v287_v41 = vadd.f32 %v271_v36, %v239_v35  ;;  %v306_v45 = vld [vmem:[#allocation2 + $0x22] sm:$0xff]  ;;  %v274_v47 = vmul.f32 -0.83852553, %v258_v44  ;;  %v352_v61 = vld [vmem:[#allocation2 + $0xb] sm:$0xff]  ;;  %v228_v62 = vld [vmem:[#allocation2 + $0x38] sm:$0xff] }
  0x14   :  { %v322_v48 = vmul.f32 -0.83852553, %v306_v45  ;;  %v852_v49 = vadd.f32 %v369_v34, %v337_v40  ;;  %v354_v51 = vld [vmem:[#allocation2 + $0x23] sm:$0xff]  ;;  %v288_v0 = vadd.f32 %v272_v57, %v240_v56  ;;  %v320_v1 = vmul.f32 -0.83852553, %v304_v60  ;;  %v260_v3 = vld [vmem:[#allocation2 + $0x39] sm:$0xff] }
  0x15   :  { %v335_v50 = vadd.f32 %v319_v42, %v287_v41  ;;  %v290_v54 = vadd.f32 %v274_v47, %v242_v46  ;;  %v370_v55 = vmul.f32 -0.2795085, %v354_v51  ;;  %v368_v2 = vmul.f32 -0.2795085, %v352_v61  ;;  %v308_v4 = vld [vmem:[#allocation2 + $0x3a] sm:$0xff]  ;;  %v227_v12 = vld [vmem:[#allocation2 + $0x30] sm:$0xff] }
  0x16   :  { %v855_v58 = vmul.f32 -0.6708204, %v852_v49  ;;  %v244_v6 = vmul.f32 -0.2795085, %v228_v62  ;;  %v276_v7 = vmul.f32 -0.83852553, %v260_v3  ;;  %v336_v9 = vadd.f32 %v320_v1, %v288_v0 }
  0x17   :  { %v857_v59 = vadd.f32 %v367_v43, %v335_v50  ;;  %v338_v63 = vadd.f32 %v322_v48, %v290_v54  ;;  %v324_v10 = vmul.f32 -0.83852553, %v308_v4  ;;  %v356_v11 = vld [vmem:[#allocation2 + $0x3b] sm:$0xff]  ;;  %v259_v13 = vld [vmem:[#allocation2 + $0x31] sm:$0xff]  ;;  %v243_v16 = vmul.f32 -0.2795085, %v227_v12 }
  0x18   :  { %451 = vrot.lane.b32.xlu1 %v855_v58, %s735_s0  ;;  %v292_v14 = vadd.f32 %v276_v7, %v244_v6  ;;  %v372_v15 = vmul.f32 -0.2795085, %v356_v11  ;;  %v275_v17 = vmul.f32 -0.83852553, %v259_v13  ;;  %v871_v19 = vadd.f32 %v368_v2, %v336_v9  ;;  %v307_v20 = vld [vmem:[#allocation2 + $0x32] sm:$0xff]  ;;  %v229_v36 = vld [vmem:[#allocation2 + $0x48] sm:$0xff] }
  0x19   :  { %v862_v5 = vmul.f32 -0.6708204, %v857_v59  ;;  %v864_v8 = vadd.f32 %v370_v55, %v338_v63  ;;  %v355_v21 = vld [vmem:[#allocation2 + $0x33] sm:$0xff]  ;;  %v323_v25 = vmul.f32 -0.83852553, %v307_v20  ;;  %v261_v37 = vld [vmem:[#allocation2 + $0x49] sm:$0xff] }
  0x1a   :  { %v230_v22 = vld [vmem:[#allocation2 + $0x50] sm:$0xff]  ;;  %v340_v23 = vadd.f32 %v324_v10, %v292_v14  ;;  %v291_v24 = vadd.f32 %v275_v17, %v243_v16  ;;  %v371_v26 = vmul.f32 -0.2795085, %v355_v21  ;;  %v876_v29 = vmul.f32 -0.6708204, %v871_v19  ;;  %v232_v46 = vld [vmem:[#allocation2 + $0x68] sm:$0xff] }
  0x1b   :  { %447 = vrot.lane.b32.xlu0 %v862_v5, %s735_s0  ;;  %v869_v18 = vmul.f32 -0.6708204, %v864_v8  ;;  %v262_v27 = vld [vmem:[#allocation2 + $0x51] sm:$0xff]  ;;  %v246_v30 = vmul.f32 -0.2795085, %v230_v22  ;;  %v264_v52 = vld [vmem:[#allocation2 + $0x69] sm:$0xff] }
  0x1c   :  { %v310_v28 = vld [vmem:[#allocation2 + $0x52] sm:$0xff]  ;;  %v278_v31 = vmul.f32 -0.83852553, %v262_v27  ;;  %v878_v32 = vadd.f32 %v372_v15, %v340_v23  ;;  %v339_v33 = vadd.f32 %v323_v25, %v291_v24  ;;  %v245_v40 = vmul.f32 -0.2795085, %v229_v36  ;;  %v309_v44 = vld [vmem:[#allocation2 + $0x4a] sm:$0xff] }
  0x1d   :  { %453 = vrot.lane.b32.xlu1 %v869_v18, %s735_s0  ;;  %v326_v34 = vmul.f32 -0.83852553, %v310_v28  ;;  %v358_v35 = vld [vmem:[#allocation2 + $0x53] sm:$0xff]  ;;  %v277_v41 = vmul.f32 -0.83852553, %v261_v37  ;;  %v357_v45 = vld [vmem:[#allocation2 + $0x4b] sm:$0xff] }
  0x1e   :  { %v294_v38 = vadd.f32 %v278_v31, %v246_v30  ;;  %v374_v39 = vmul.f32 -0.2795085, %v358_v35  ;;  %v883_v42 = vmul.f32 -0.6708204, %v878_v32  ;;  %v885_v43 = vadd.f32 %v371_v26, %v339_v33  ;;  %v312_v53 = vld [vmem:[#allocation2 + $0x6a] sm:$0xff]  ;;  %v231_v63 = vld [vmem:[#allocation2 + $0x60] sm:$0xff] }
  0x1f   :  { %449 = vrot.lane.b32.xlu0 %v876_v29, %s735_s0  ;;  %v293_v48 = vadd.f32 %v277_v41, %v245_v40  ;;  %v325_v50 = vmul.f32 -0.83852553, %v309_v44  ;;  %v373_v51 = vmul.f32 -0.2795085, %v357_v45  ;;  %v248_v55 = vmul.f32 -0.2795085, %v232_v46 }
  0x20   :  { %v342_v47 = vadd.f32 %v326_v34, %v294_v38  ;;  %v890_v54 = vmul.f32 -0.6708204, %v885_v43  ;;  %v280_v56 = vmul.f32 -0.83852553, %v264_v52  ;;  %v328_v61 = vmul.f32 -0.83852553, %v312_v53 }
  0x21   :  { %457 = vrot.lane.b32.xlu1 %v883_v42, %s735_s0  ;;  %v341_v60 = vadd.f32 %v325_v50, %v293_v48  ;;  %v360_v62 = vld [vmem:[#allocation2 + $0x6b] sm:$0xff]  ;;  %v263_v0 = vld [vmem:[#allocation2 + $0x61] sm:$0xff]  ;;  %v247_v3 = vmul.f32 -0.2795085, %v231_v63  ;;  %v233_v27 = vld [vmem:[#allocation2 + $0x78] sm:$0xff] }
  0x22   :  { %v892_v57 = vadd.f32 %v374_v39, %v342_v47  ;;  %v296_v1 = vadd.f32 %v280_v56, %v248_v55  ;;  %v376_v2 = vmul.f32 -0.2795085, %v360_v62  ;;  %v279_v4 = vmul.f32 -0.83852553, %v263_v0  ;;  %v311_v9 = vld [vmem:[#allocation2 + $0x62] sm:$0xff]  ;;  %v265_v28 = vld [vmem:[#allocation2 + $0x79] sm:$0xff] }
  0x23   :  { %455 = vrot.lane.b32.xlu0 %v890_v54, %s735_s0  ;;  %v899_v7 = vadd.f32 %v373_v51, %v341_v60  ;;  %v359_v10 = vld [vmem:[#allocation2 + $0x63] sm:$0xff]  ;;  %v327_v14 = vmul.f32 -0.83852553, %v311_v9  ;;  %v249_v33 = vmul.f32 -0.2795085, %v233_v27  ;;  %v313_v37 = vld [vmem:[#allocation2 + $0x7a] sm:$0xff] }
  0x24   :  { %v897_v6 = vmul.f32 -0.6708204, %v892_v57  ;;  %v234_v11 = vld [vmem:[#allocation2 + $0x80] sm:$0xff]  ;;  %v344_v12 = vadd.f32 %v328_v61, %v296_v1  ;;  %v295_v13 = vadd.f32 %v279_v4, %v247_v3  ;;  %v375_v15 = vmul.f32 -0.2795085, %v359_v10  ;;  %v236_v39 = vld [vmem:[#allocation2 + $0x98] sm:$0xff] }
  0x25   :  { %v266_v16 = vld [vmem:[#allocation2 + $0x81] sm:$0xff]  ;;  %v904_v20 = vmul.f32 -0.6708204, %v899_v7  ;;  %v250_v21 = vmul.f32 -0.2795085, %v234_v11  ;;  %v268_v46 = vld [vmem:[#allocation2 + $0x99] sm:$0xff] }
  0x26   :  { %v314_v17 = vld [vmem:[#allocation2 + $0x82] sm:$0xff]  ;;  %461 = vrot.lane.b32.xlu1 %v897_v6, %s735_s0  ;;  %v282_v22 = vmul.f32 -0.83852553, %v266_v16  ;;  %v906_v23 = vadd.f32 %v376_v2, %v344_v12  ;;  %v343_v24 = vadd.f32 %v327_v14, %v295_v13  ;;  %v281_v34 = vmul.f32 -0.83852553, %v265_v28  ;;  %v316_v47 = vld [vmem:[#allocation2 + $0x9a] sm:$0xff] }
  0x27   :  { %v330_v25 = vmul.f32 -0.83852553, %v314_v17  ;;  %v362_v26 = vld [vmem:[#allocation2 + $0x83] sm:$0xff]  ;;  %459 = vrot.lane.b32.xlu0 %v904_v20, %s735_s0  ;;  %v361_v38 = vld [vmem:[#allocation2 + $0x7b] sm:$0xff]  ;;  %v329_v44 = vmul.f32 -0.83852553, %v313_v37 }
  0x28   :  { %v298_v30 = vadd.f32 %v282_v22, %v250_v21  ;;  %v378_v31 = vmul.f32 -0.2795085, %v362_v26  ;;  %v911_v35 = vmul.f32 -0.6708204, %v906_v23  ;;  %v913_v36 = vadd.f32 %v375_v15, %v343_v24  ;;  %v364_v56 = vld [vmem:[#allocation2 + $0x9b] sm:$0xff]  ;;  %v235_v60 = vld [vmem:[#allocation2 + $0x90] sm:$0xff] }
  0x29   :  { %v297_v41 = vadd.f32 %v281_v34, %v249_v33  ;;  %v377_v45 = vmul.f32 -0.2795085, %v361_v38  ;;  %v252_v50 = vmul.f32 -0.2795085, %v236_v39  ;;  %v284_v51 = vmul.f32 -0.83852553, %v268_v46 }
  0x2a   :  { %v346_v40 = vadd.f32 %v330_v25, %v298_v30  ;;  %465 = vrot.lane.b32.xlu1 %v911_v35, %s735_s0  ;;  %v918_v48 = vmul.f32 -0.6708204, %v913_v36  ;;  %v332_v55 = vmul.f32 -0.83852553, %v316_v47  ;;  %v267_v61 = vld [vmem:[#allocation2 + $0x91] sm:$0xff]  ;;  %v237_v28 = vld [vmem:[#allocation2 + $0xa8] sm:$0xff] }
  0x2b   :  { %v345_v53 = vadd.f32 %v329_v44, %v297_v41  ;;  %v300_v62 = vadd.f32 %v284_v51, %v252_v50  ;;  %v380_v63 = vmul.f32 -0.2795085, %v364_v56  ;;  %v251_v0 = vmul.f32 -0.2795085, %v235_v60  ;;  %v315_v4 = vld [vmem:[#allocation2 + $0x92] sm:$0xff]  ;;  %v269_v30 = vld [vmem:[#allocation2 + $0xa9] sm:$0xff] }
  0x2c   :  { %v920_v52 = vadd.f32 %v378_v31, %v346_v40  ;;  %463 = vrot.lane.b32.xlu0 %v918_v48, %s735_s0  ;;  %v283_v1 = vmul.f32 -0.83852553, %v267_v61  ;;  %v363_v9 = vld [vmem:[#allocation2 + $0x93] sm:$0xff]  ;;  %v331_v13 = vmul.f32 -0.83852553, %v315_v4  ;;  %v317_v40 = vld [vmem:[#allocation2 + $0xaa] sm:$0xff] }
  0x2d   :  { %v925_v3 = vadd.f32 %v377_v45, %v345_v53  ;;  %v238_v10 = vld [vmem:[#allocation2 + $0xb0] sm:$0xff]  ;;  %v348_v11 = vadd.f32 %v332_v55, %v300_v62  ;;  %v379_v14 = vmul.f32 -0.2795085, %v363_v9  ;;  %v253_v34 = vmul.f32 -0.2795085, %v237_v28 }
  0x2e   :  { %v426_v2 = vmul.f32 -0.6708204, %v920_v52  ;;  %v299_v12 = vadd.f32 %v283_v1, %v251_v0  ;;  %v270_v15 = vld [vmem:[#allocation2 + $0xb1] sm:$0xff]  ;;  %v254_v21 = vmul.f32 -0.2795085, %v238_v10 }
  0x2f   :  { %v318_v16 = vld [vmem:[#allocation2 + $0xb2] sm:$0xff]  ;;  %v425_v17 = vmul.f32 -0.6708204, %v925_v3  ;;  %v286_v22 = vmul.f32 -0.83852553, %v270_v15  ;;  %v929_v24 = vadd.f32 %v380_v63, %v348_v11 }
  0x30   :  { %469 = vrot.lane.b32.xlu1 %v426_v2, %s735_s0  ;;  %v347_v25 = vadd.f32 %v331_v13, %v299_v12  ;;  %v334_v26 = vmul.f32 -0.83852553, %v318_v16  ;;  %v366_v27 = vld [vmem:[#allocation2 + $0xb3] sm:$0xff]  ;;  %v285_v37 = vmul.f32 -0.83852553, %v269_v30  ;;  %v365_v41 = vld [vmem:[#allocation2 + $0xab] sm:$0xff] }
  0x31   :  { %467 = vrot.lane.b32.xlu0 %v425_v17, %s735_s0  ;;  %v302_v31 = vadd.f32 %v286_v22, %v254_v21  ;;  %v382_v33 = vmul.f32 -0.2795085, %v366_v27  ;;  %v428_v38 = vmul.f32 -0.6708204, %v929_v24  ;;  %v333_v46 = vmul.f32 -0.83852553, %v317_v40 }
  0x32   :  { %v395_v39 = vadd.f32 %v379_v14, %v347_v25  ;;  %v301_v45 = vadd.f32 %v285_v37, %v253_v34  ;;  %v381_v47 = vmul.f32 -0.2795085, %v365_v41 }
  0x33   :  { %v350_v44 = vadd.f32 %v334_v26, %v302_v31 }
  0x34   :  { %7 = vsyncpa [#allocation6], 0  ;;  %473 = vrot.lane.b32.xlu1 %v428_v38, %s735_s0  ;;  %v427_v50 = vmul.f32 -0.6708204, %v395_v39  ;;  %v349_v53 = vadd.f32 %v333_v46, %v301_v45  ;;  %s736_s1 = smov 126   ;;  %s737_s29 = smov 125  }
  0x35   :  { %v398_v51 = vadd.f32 %v382_v33, %v350_v44  ;;  %vm655_vm1 = vcmask 130048   ;;  %s738_s30 = smov [#allocation5]  }
  0x36   :  { %471 = vrot.lane.b32.xlu0 %v427_v50, %s735_s0  ;;  %v397_v56 = vadd.f32 %v381_v47, %v349_v53  ;;  %s677_s3 = sshll.u32 %s738_s30, 4  ;;  %s678_s3 = int_to_ptr.vmem [resolvable:$true] %s677_s3 }
  0x37   :  { %v430_v55 = vmul.f32 -0.6708204, %v398_v51  ;;  %s711_s4 = scalar_lea.vmem %s678_s3, 2048  ;;  %p716_p1 = scmp.lt.s32.totalorder %s678_s3, %s678_s3 }
  0x38   :  { %v429_v60 = vmul.f32 -0.6708204, %v397_v56  ;;  %p712_p0 = scmp.ne.s32.totalorder %s678_s3, %s711_s4  ;;  %p717_p2 = scmp.lt.s32.totalorder %s711_s4, %s711_s4 }
  0x39   :  { %477 = vrot.lane.b32.xlu1 %v430_v55, %s735_s0 }
  0x3a   :  { %475 = vrot.lane.b32.xlu0 %v429_v60, %s735_s0  ;;  %p718_p3 = por %p717_p2, %p716_p1 }
  0x3c   :  { %p719_p4 = pnand %p718_p3, %p712_p0 }
  0x3d   :  { %513 = vrot.lane.b32.xlu1 %v876_v29, %s736_s1  ;;  %v401_v29 = vmul.f32 -0.2236068, %v852_v49  ;;  %v976_v49 = vmul.f32 -0.2236068, %v906_v23 }
  0x3e   :  { %511 = vrot.lane.b32.xlu0 %v862_v5, %s736_s1  ;;  %v948_v5 = vmul.f32 -0.2236068, %v871_v19  ;;  %v964_v19 = vmul.f32 -0.2236068, %v885_v43  ;;  %v984_v43 = vmul.f32 -0.2236068, %v920_v52 }
  0x41   :  { %517 = vrot.lane.b32.xlu1 %v869_v18, %s736_s1  ;;  %v955_v18 = vmul.f32 -0.2236068, %v864_v8  ;;  %v972_v8 = vmul.f32 -0.2236068, %v899_v7  ;;  %v998_v7 = vmul.f32 -0.2236068, %v398_v51 }
  0x42   :  { %515 = vrot.lane.b32.xlu0 %v855_v58, %s736_s1  ;;  %v951_v58 = vmul.f32 -0.2236068, %v857_v59  ;;  %v968_v59 = vmul.f32 -0.2236068, %v892_v57  ;;  %v992_v57 = vmul.f32 -0.2236068, %v929_v24 }
  0x45   :  { %521 = vrot.lane.b32.xlu1 %v883_v42, %s736_s1  ;;  %v961_v42 = vmul.f32 -0.2236068, %v878_v32  ;;  %v980_v32 = vmul.f32 -0.2236068, %v913_v36 }
  0x46   :  { %519 = vrot.lane.b32.xlu0 %v890_v54, %s736_s1  ;;  %v988_v54 = vmul.f32 -0.2236068, %v925_v3 }
  0x49   :  { %525 = vrot.lane.b32.xlu1 %v897_v6, %s736_s1  ;;  %v995_v6 = vmul.f32 -0.2236068, %v395_v39 }
  0x4a   :  { %523 = vrot.lane.b32.xlu0 %v904_v20, %s736_s1  ;;  %v1001_v20 = vmul.f32 -0.2236068, %v397_v56 }
  0x4d   :  { %529 = vrot.lane.b32.xlu1 %v911_v35, %s736_s1 }
  0x4e   :  { %527 = vrot.lane.b32.xlu0 %v918_v48, %s736_s1 }
  0x51   :  { %533 = vrot.lane.b32.xlu1 %v426_v2, %s736_s1 }
  0x52   :  { %531 = vrot.lane.b32.xlu0 %v425_v17, %s736_s1 }
  0x55   :  { %537 = vrot.lane.b32.xlu1 %v428_v38, %s736_s1 }
  0x56   :  { %535 = vrot.lane.b32.xlu0 %v427_v50, %s736_s1 }
  0x59   :  { %541 = vrot.lane.b32.xlu1 %v430_v55, %s736_s1 }
  0x5a   :  { %539 = vrot.lane.b32.xlu0 %v429_v60, %s736_s1 }
  0x5d   :  { %593 = vrot.lane.b32.xlu1 %v948_v5, %s737_s29 }
  0x5e   :  { %591 = vrot.lane.b32.xlu0 %v951_v58, %s737_s29 }
  0x61   :  { %597 = vrot.lane.b32.xlu1 %v955_v18, %s737_s29 }
  0x62   :  { %595 = vrot.lane.b32.xlu0 %v401_v29, %s737_s29 }
  0x65   :  { %601 = vrot.lane.b32.xlu1 %v961_v42, %s737_s29 }
  0x66   :  { %599 = vrot.lane.b32.xlu0 %v964_v19, %s737_s29 }
  0x69   :  { %605 = vrot.lane.b32.xlu1 %v968_v59, %s737_s29 }
  0x6a   :  { %603 = vrot.lane.b32.xlu0 %v972_v8, %s737_s29 }
  0x6d   :  { %609 = vrot.lane.b32.xlu1 %v976_v49, %s737_s29 }
  0x6e   :  { %607 = vrot.lane.b32.xlu0 %v980_v32, %s737_s29 }
  0x71   :  { %613 = vrot.lane.b32.xlu1 %v984_v43, %s737_s29 }
  0x72   :  { %611 = vrot.lane.b32.xlu0 %v988_v54, %s737_s29 }
  0x75   :  { %617 = vrot.lane.b32.xlu1 %v992_v57, %s737_s29 }
  0x76   :  { %615 = vrot.lane.b32.xlu0 %v995_v6, %s737_s29 }
  0x79   :  { %621 = vrot.lane.b32.xlu1 %v998_v7, %s737_s29 }
  0x7a   :  { %619 = vrot.lane.b32.xlu0 %v1001_v20, %s737_s29 }
  0x8a   :  { %v452_v23 = vpop.permute.xlu1 %451 }
  0x8b   :  { %v497_v35 = vadd.f32 %v452_v23, %v401_v29 }
  0x8d   :  { %v448_v36 = vpop.permute.xlu0 %447 }
  0x8e   :  { %v495_v38 = vadd.f32 %v448_v36, %v951_v58 }
  0x8f   :  { %v454_v48 = vpop.permute.xlu1 %453 }
  0x90   :  { %v498_v41 = vadd.f32 %v454_v48, %v955_v18 }
  0x91   :  { %v450_v52 = vpop.permute.xlu0 %449 }
  0x92   :  { %v496_v34 = vadd.f32 %v450_v52, %v948_v5 }
  0x93   :  { %v458_v61 = vpop.permute.xlu1 %457 }
  0x94   :  { %v500_v53 = vadd.f32 %v458_v61, %v961_v42 }
  0x95   :  { %v456_v62 = vpop.permute.xlu0 %455 }
  0x96   :  { %v499_v5 = vadd.f32 %v456_v62, %v964_v19 }
  0x98   :  { %v462_v63 = vpop.permute.xlu1 %461 }
  0x99   :  { %v460_v0 = vpop.permute.xlu0 %459  ;;  %v502_v23 = vadd.f32 %v462_v63, %v968_v59 }
  0x9a   :  { %v501_v42 = vadd.f32 %v460_v0, %v972_v8 }
  0x9c   :  { %v466_v1 = vpop.permute.xlu1 %465 }
  0x9d   :  { %v504_v19 = vadd.f32 %v466_v1, %v976_v49 }
  0x9e   :  { %v464_v2 = vpop.permute.xlu0 %463 }
  0x9f   :  { %v503_v59 = vadd.f32 %v464_v2, %v980_v32 }
  0xa2   :  { %v1005_v3 = vpop.permute.xlu1 %469 }
  0xa3   :  { %v1007_v4 = vpop.permute.xlu0 %467  ;;  %v506_v8 = vadd.f32 %v1005_v3, %v984_v43 }
  0xa4   :  { %v505_v1 = vadd.f32 %v1007_v4, %v988_v54 }
  0xa6   :  { %v1009_v9 = vpop.permute.xlu1 %473 }
  0xa8   :  { %v1011_v10 = vpop.permute.xlu0 %471 }
  0xab   :  { %v1013_v11 = vpop.permute.xlu1 %477 }
  0xac   :  { %v1015_v12 = vpop.permute.xlu0 %475 }
  0xaf   :  { %v514_v13 = vpop.permute.xlu1 %513 }
  0xb0   :  { %v512_v14 = vpop.permute.xlu0 %511  ;;  %v560_v39 = vadd.f32 %v514_v13, %v496_v34 }
  0xb1   :  { %v559_v44 = vadd.f32 %v512_v14, %v495_v38 }
  0xb3   :  { %v518_v15 = vpop.permute.xlu1 %517 }
  0xb4   :  { %v516_v16 = vpop.permute.xlu0 %515  ;;  %v562_v47 = vadd.f32 %v518_v15, %v498_v41 }
  0xb5   :  { %v561_v55 = vadd.f32 %v516_v16, %v497_v35 }
  0xb7   :  { %v522_v17 = vpop.permute.xlu1 %521 }
  0xb8   :  { %v520_v21 = vpop.permute.xlu0 %519  ;;  %v564_v58 = vadd.f32 %v522_v17, %v500_v53 }
  0xb9   :  { %v563_v36 = vadd.f32 %v520_v21, %v499_v5 }
  0xbb   :  { %v526_v22 = vpop.permute.xlu1 %525 }
  0xbc   :  { %v524_v24 = vpop.permute.xlu0 %523  ;;  %v566_v35 = vadd.f32 %v526_v22, %v502_v23 }
  0xbd   :  { %v565_v62 = vadd.f32 %v524_v24, %v501_v42  ;;  %v508_v24 = vadd.f32 %v1009_v9, %v992_v57 }
  0xbf   :  { %v530_v25 = vpop.permute.xlu1 %529 }
  0xc0   :  { %v528_v26 = vpop.permute.xlu0 %527  ;;  %v568_v63 = vadd.f32 %v530_v25, %v504_v19 }
  0xc1   :  { %v567_v0 = vadd.f32 %v528_v26, %v503_v59  ;;  %v507_v26 = vadd.f32 %v1011_v10, %v995_v6 }
  0xc3   :  { %v534_v27 = vpop.permute.xlu1 %533 }
  0xc4   :  { %v532_v28 = vpop.permute.xlu0 %531  ;;  %v570_v22 = vadd.f32 %v534_v27, %v506_v8  ;;  %v510_v27 = vadd.f32 %v1013_v11, %v998_v7 }
  0xc5   :  { %v569_v25 = vadd.f32 %v532_v28, %v505_v1  ;;  %v509_v28 = vadd.f32 %v1015_v12, %v1001_v20 }
  0xc7   :  { %v1017_v30 = vpop.permute.xlu1 %537 }
  0xc8   :  { %v1019_v31 = vpop.permute.xlu0 %535  ;;  %v572_v34 = vadd.f32 %v1017_v30, %v508_v24 }
  0xc9   :  { %v571_v38 = vadd.f32 %v1019_v31, %v507_v26 }
  0xcb   :  { %v1021_v33 = vpop.permute.xlu1 %541 }
  0xcc   :  { %v1024_v37 = vpop.permute.xlu0 %539  ;;  %v574_v6 = vadd.f32 %v1021_v33, %v510_v27 }
  0xcf   :  { %v594_v40 = vpop.permute.xlu1 %593 }
  0xd0   :  { %v640_v45 = vadd.f32 %v594_v40, %v560_v39  ;;  %v592_v46 = vpop.permute.xlu0 %591  ;;  %v573_v39 = vadd.f32 %v1024_v37, %v509_v28 }
  0xd1   :  { %v639_v50 = vadd.f32 %v592_v46, %v559_v44 }
  0xd2   :  { %657 = vst.msk [vmem:[#allocation5 + $0x8] sm:$0xff] %vm655_vm1, %v640_v45 }
  0xd3   :  { %v598_v51 = vpop.permute.xlu1 %597  ;;  %656 = vst.msk [vmem:[#allocation5] sm:$0xff] %vm655_vm1, %v639_v50 }
  0xd4   :  { %v642_v56 = vadd.f32 %v598_v51, %v562_v47  ;;  %v596_v60 = vpop.permute.xlu0 %595 }
  0xd5   :  { %v641_v18 = vadd.f32 %v596_v60, %v561_v55 }
  0xd6   :  { %659 = vst.msk [vmem:[#allocation5 + $0x18] sm:$0xff] %vm655_vm1, %v642_v56 }
  0xd7   :  { %v602_v29 = vpop.permute.xlu1 %601  ;;  %658 = vst.msk [vmem:[#allocation5 + $0x10] sm:$0xff] %vm655_vm1, %v641_v18 }
  0xd8   :  { %v644_v48 = vadd.f32 %v602_v29, %v564_v58  ;;  %v600_v52 = vpop.permute.xlu0 %599 }
  0xd9   :  { %v643_v61 = vadd.f32 %v600_v52, %v563_v36 }
  0xda   :  { %661 = vst.msk [vmem:[#allocation5 + $0x28] sm:$0xff] %vm655_vm1, %v644_v48 }
  0xdb   :  { %v606_v13 = vpop.permute.xlu1 %605  ;;  %660 = vst.msk [vmem:[#allocation5 + $0x20] sm:$0xff] %vm655_vm1, %v643_v61 }
  0xdc   :  { %v646_v14 = vadd.f32 %v606_v13, %v566_v35  ;;  %v604_v15 = vpop.permute.xlu0 %603 }
  0xdd   :  { %v645_v16 = vadd.f32 %v604_v15, %v565_v62 }
  0xde   :  { %663 = vst.msk [vmem:[#allocation5 + $0x38] sm:$0xff] %vm655_vm1, %v646_v14 }
  0xdf   :  { %v610_v17 = vpop.permute.xlu1 %609  ;;  %662 = vst.msk [vmem:[#allocation5 + $0x30] sm:$0xff] %vm655_vm1, %v645_v16 }
  0xe0   :  { %v648_v21 = vadd.f32 %v610_v17, %v568_v63  ;;  %v608_v49 = vpop.permute.xlu0 %607 }
  0xe1   :  { %v647_v32 = vadd.f32 %v608_v49, %v567_v0 }
  0xe2   :  { %665 = vst.msk [vmem:[#allocation5 + $0x48] sm:$0xff] %vm655_vm1, %v648_v21 }
  0xe3   :  { %v614_v2 = vpop.permute.xlu1 %613  ;;  %664 = vst.msk [vmem:[#allocation5 + $0x40] sm:$0xff] %vm655_vm1, %v647_v32 }
  0xe4   :  { %v650_v43 = vadd.f32 %v614_v2, %v570_v22  ;;  %v612_v3 = vpop.permute.xlu0 %611 }
  0xe5   :  { %v649_v54 = vadd.f32 %v612_v3, %v569_v25 }
  0xe6   :  { %667 = vst.msk [vmem:[#allocation5 + $0x58] sm:$0xff] %vm655_vm1, %v650_v43 }
  0xe7   :  { %v618_v4 = vpop.permute.xlu1 %617  ;;  %666 = vst.msk [vmem:[#allocation5 + $0x50] sm:$0xff] %vm655_vm1, %v649_v54 }
  0xe8   :  { %v652_v57 = vadd.f32 %v618_v4, %v572_v34  ;;  %v616_v9 = vpop.permute.xlu0 %615 }
  0xe9   :  { %v651_v10 = vadd.f32 %v616_v9, %v571_v38 }
  0xea   :  { %669 = vst.msk [vmem:[#allocation5 + $0x68] sm:$0xff] %vm655_vm1, %v652_v57 }
  0xeb   :  { %v622_v30 = vpop.permute.xlu1 %621  ;;  %668 = vst.msk [vmem:[#allocation5 + $0x60] sm:$0xff] %vm655_vm1, %v651_v10 }
  0xec   :  { %v654_v7 = vadd.f32 %v622_v30, %v574_v6  ;;  %v620_v11 = vpop.permute.xlu0 %619 }
  0xed   :  { %v653_v31 = vadd.f32 %v620_v11, %v573_v39 }
  0xee   :  { %671 = vst.msk [vmem:[#allocation5 + $0x78] sm:$0xff] %vm655_vm1, %v654_v7 }
  0xef   :  { %670 = vst.msk [vmem:[#allocation5 + $0x70] sm:$0xff] %vm655_vm1, %v653_v31 }
  0xf0   :  { %722 = shalt.err (!%p719_p4)
}
  0xf1   :  { %s723_s7 = scalar_lea.hbm %s1080_s2, 2048 }
  0xf2   :  { %p724_p5 = scmp.ne.s32.totalorder %s1080_s2, %s723_s7  ;;  %p727_p6 = scmp.lt.u32.totalorder %s723_s7, %s1080_s2 }
  0xf4   :  { %p729_p7 = pnand %p727_p6, %p724_p5 }
  0xf6   :  { %732 = shalt.err (!%p729_p7)
}
  0xf7   :  { %s739_s12 = smov 128   ;;  %s740_s13 = smov 8  }
  0xf8   :  { %683 = dma.vmem_to_hbm [thread:$0]  %s678_s3, 2048, %s1080_s2, [#allocation6], %s739_s12, %s739_s12, %s740_s13  }
  0xf9   :  { %733 = dma.done.wait [#allocation6], 2048  }
  0xfa   :  { %734 = vsyncadd [#allocation6], 4294965248 }
  0xfb   :  { %687 = vsyncpa [#allocation6], 1 }

</bundles_post_ra>
